<compile_context>
chip_gen: v7x
topology: tpu7x:2x2x1
jax: 0.10.0
libtpu: 0.0.40
codegen_flags: <defaults>
</compile_context>

<pallas_src>
import functools

import jax
import jax.numpy as jnp
from jax.experimental import pallas as pl
from jax.experimental.pallas import tpu as pltpu


# Union of the taps used by conv33 (offsets {-1,0,1}^2) and conv33_di
# (dilation 2 -> offsets {-2,0,2}^2); conv11 only touches (0, 0).
# 9 + 9 - 1 = 17 distinct taps.  Order is shared by wrapper and kernel.
_TAPS = tuple(sorted(
    {(dh, dw) for dh in (-1, 0, 1) for dw in (-1, 0, 1)} |
    {(dh, dw) for dh in (-2, 0, 2) for dw in (-2, 0, 2)}))
_N_TAPS = len(_TAPS)          # 17
_N_SLOTS = _N_TAPS + 1        # +1 ones/shift pseudo-tap (folds BN shift into GEMM)


def _round_up(v, m):
    return (v + m - 1) // m * m


def _feature_fuse_kernel(x_ref, wc_ref, mask_ref, o_ref, xbig_ref, p_ref,
                         *, H, W, B, pad):
    """One grid step = B images.

    x_ref:    (1, Cp, B*HW)  f32   channel-padded flattened images
    wc_ref:   (Cout, 18*Cp)  bf16  folded conv weights * BN scale (+ shift col)
    mask_ref: (Mr, B*HW)     f32   per-tap 0/1 boundary masks (rows 0..16 used)
    o_ref:    (1, Cout, B*HW) f32  flattened output
    xbig_ref: (Cp, B*HW+2*pad) f32 zero-margined line buffer (VMEM scratch)
    p_ref:    (18*Cp, B*HW)  bf16  patch matrix (VMEM scratch)
    """
    HW = H * W
    BHW = B * HW
    Cp = x_ref.shape[1]

    # Zero the margins every step (deliberately NOT behind pl.when(step==0):
    # on v7x the grid may be megacore-split and a core never sees step 0),
    # then drop the images into the middle.  pad is a multiple of 128, so the
    # central copy is lane-aligned.
    zm = jnp.zeros((Cp, pad), dtype=xbig_ref.dtype)
    xbig_ref[:, pl.ds(0, pad)] = zm
    xbig_ref[:, pl.ds(pad + BHW, pad)] = zm
    xbig_ref[:, pl.ds(pad, BHW)] = x_ref[0]

    def piece(slot):
        """(Cp, BHW) f32 rows of the patch matrix for pseudo-tap `slot`."""
        if slot < _N_TAPS:
            dh, dw = _TAPS[slot]
            s = dh * W + dw                               # flat shift, |s| <= pad
            xs = xbig_ref[:, pl.ds(pad + s, BHW)]         # one static shifted read
            if dh == 0 and dw == 0:
                return xs                                 # centre tap: no boundary
            # Precomputed 0/1 mask realizes the zero padding of the 3x3 and
            # dilated-3x3 convs (H and W directions, including the image-to-
            # image boundary when B > 1).
            return xs * mask_ref[pl.ds(slot, 1), :]
        # Last pseudo-tap: all-ones rows; only its first wc column carries the
        # BN shift (the rest are zero), so the shift rides the GEMM for free.
        return jnp.ones((Cp, BHW), dtype=jnp.float32)

    # Pair taps when Cp % 16 == 8 so every bf16 store is a full (16,128)-tile
    # aligned write (no masked partial vst); single-tap stores when Cp % 16 == 0.
    tpg = 2 if (Cp % 16) else 1
    rows = tpg * Cp
    for g in range(_N_SLOTS // tpg):
        parts = [piece(g * tpg + j) for j in range(tpg)]
        blk = parts[0] if tpg == 1 else jnp.concatenate(parts, axis=0)
        p_ref[pl.ds(g * rows, rows), :] = blk.astype(p_ref.dtype)

    # Single bf16 MXU GEMM with f32 accumulation: (Cout, K) @ (K, B*HW).
    acc = jnp.dot(wc_ref[...], p_ref[...], preferred_element_type=jnp.float32)
    o_ref[0] = acc.astype(o_ref.dtype)


def feature_fuse(x_nchw, params):
    """Forward pass. x_nchw: (N, Cin, H, W) f32 -> (N, Cout, H, W) f32."""
    w11, w33, wdi, gamma, beta, mean, var, eps = params
    N, Cin, H, W = x_nchw.shape
    Cout = w11.shape[0]
    HW = H * W

    # TODO(synk): BatchNorm2d is implemented in eval mode (running stats);
    # training-mode batch statistics are not computed in-kernel.
    scale = gamma / jnp.sqrt(var + eps)                   # (Cout,)
    shift = beta - mean * scale                           # (Cout,)

    Cp = _round_up(Cin, 8)                                # sublane-aligned P rows
    PAD = _round_up(2 * W + 2, 128)                       # >= max |flat shift|, lane-aligned
    assert PAD >= 2 * W + 2

    # ---- images per grid step -------------------------------------------------
    # Widen the GEMM's streamed (lane) dimension by packing B images per step;
    # keep >= 2 steps when N >= 2 (both v7x TensorCores busy) and cap the
    # per-step VMEM footprint.
    def _step_bytes(b):
        bhw = b * HW
        return (Cp * (bhw + 2 * PAD) * 4                  # xbig line buffer (f32)
                + _N_SLOTS * Cp * bhw * 2                 # P patch matrix (bf16)
                + 2 * Cp * bhw * 4                        # double-buffered input
                + 2 * Cout * bhw * 4                      # double-buffered output
                + _round_up(_N_TAPS, 8) * bhw * 4)        # boundary masks

    max_parallel = 2 if N >= 2 else 1
    B = max(1, -(-N // max_parallel))                     # ceil(N / max_parallel)
    while B > 1 and _step_bytes(B) > 12 * 1024 * 1024:
        B -= 1
    G = -(-N // B)
    N_pad = G * B
    BHW = B * HW
    K = _N_SLOTS * Cp

    # ---- fold 1x1 / 3x3 / dilated-3x3 weights (OIHW) + BN scale & shift into
    # ---- one (Cout, K) bf16 tap matrix (wrapper-side, done once) --------------
    blocks = []
    for (dh, dw) in _TAPS:
        col = jnp.zeros((Cout, Cin), jnp.float32)
        if dh == 0 and dw == 0:
            col = col + w11[:, :, 0, 0]
        if abs(dh) <= 1 and abs(dw) <= 1:
            col = col + w33[:, :, dh + 1, dw + 1]
        if dh % 2 == 0 and dw % 2 == 0:
            col = col + wdi[:, :, dh // 2 + 1, dw // 2 + 1]
        wt = jnp.zeros((Cout, Cp), jnp.float32).at[:, :Cin].set(col * scale[:, None])
        blocks.append(wt)
    # ones-row pseudo-tap: first column carries the BN shift, rest stay zero.
    blocks.append(jnp.zeros((Cout, Cp), jnp.float32).at[:, 0].set(shift))
    wc = jnp.concatenate(blocks, axis=1).astype(jnp.bfloat16)      # (Cout, K)

    # ---- image-independent boundary masks, hoisted out of the per-step path ---
    pos = jnp.arange(BHW, dtype=jnp.int32)
    hh = (pos % HW) // W
    ww = pos % W
    mask_rows = []
    for (dh, dw) in _TAPS:
        ok = (hh + dh >= 0) & (hh + dh < H) & (ww + dw >= 0) & (ww + dw < W)
        mask_rows.append(ok.astype(jnp.float32))
    Mr = _round_up(_N_TAPS, 8)
    mask = jnp.zeros((Mr, BHW), jnp.float32).at[:_N_TAPS].set(jnp.stack(mask_rows))

    # ---- layout: channel-pad, batch-pad, pack B images per step on the lanes --
    x_flat = x_nchw.astype(jnp.float32).reshape(N, Cin, HW)
    if Cp > Cin:
        x_flat = jnp.concatenate(
            [x_flat, jnp.zeros((N, Cp - Cin, HW), jnp.float32)], axis=1)
    if N_pad > N:
        x_flat = jnp.concatenate(
            [x_flat, jnp.zeros((N_pad - N, Cp, HW), jnp.float32)], axis=0)
    x_steps = (x_flat.reshape(G, B, Cp, HW)
               .transpose(0, 2, 1, 3)
               .reshape(G, Cp, BHW))                      # lane axis = [b][h][w]

    kernel = functools.partial(_feature_fuse_kernel, H=H, W=W, B=B, pad=PAD)
    out = pl.pallas_call(
        kernel,
        out_shape=jax.ShapeDtypeStruct((G, Cout, BHW), jnp.float32),
        grid_spec=pltpu.PrefetchScalarGridSpec(
            num_scalar_prefetch=0,
            grid=(G,),
            in_specs=[
                pl.BlockSpec((1, Cp, BHW), lambda i: (i, 0, 0)),
                pl.BlockSpec((Cout, K), lambda i: (0, 0)),     # resident weights
                pl.BlockSpec((Mr, BHW), lambda i: (0, 0)),     # resident masks
            ],
            out_specs=pl.BlockSpec((1, Cout, BHW), lambda i: (i, 0, 0)),
            scratch_shapes=[
                pltpu.VMEM((Cp, BHW + 2 * PAD), jnp.float32),  # line buffer
                pltpu.VMEM((K, BHW), jnp.bfloat16),            # patch matrix
            ],
        ),
        compiler_params=pltpu.CompilerParams(
            dimension_semantics=("parallel",)),
    )(x_steps, wc, mask)

    # TODO(synk): at UNet-scale Cin/HW, tile the contraction over tap groups
    # (accumulate several (Cout, g*Cp) @ (g*Cp, B*HW) GEMMs into an f32 scratch)
    # instead of materializing the full patch matrix, to stay within v7x's
    # 64 MiB VMEM.

    out = (out.reshape(G, Cout, B, HW)
           .transpose(0, 2, 1, 3)
           .reshape(N_pad, Cout, HW)[:N])
    return out.reshape(N, Cout, H, W)


def init_params(key, in_c, out_c):
    """Deterministic parameter init (PyTorch OIHW conv layout, BN eval stats)."""
    k1, k2, k3, k4, k5, k6, k7 = jax.random.split(key, 7)
    b1 = 1.0 / (in_c ** 0.5)
    b3 = 1.0 / ((in_c * 9) ** 0.5)
    w11 = jax.random.uniform(k1, (out_c, in_c, 1, 1), jnp.float32, -b1, b1)
    w33 = jax.random.uniform(k2, (out_c, in_c, 3, 3), jnp.float32, -b3, b3)
    wdi = jax.random.uniform(k3, (out_c, in_c, 3, 3), jnp.float32, -b3, b3)
    gamma = jax.random.uniform(k4, (out_c,), jnp.float32, 0.5, 1.5)
    beta = jax.random.uniform(k5, (out_c,), jnp.float32, -0.5, 0.5)
    mean = 0.1 * jax.random.normal(k6, (out_c,), jnp.float32)
    var = jax.random.uniform(k7, (out_c,), jnp.float32, 0.5, 1.5)
    eps = 1e-5
    return (w11, w33, wdi, gamma, beta, mean, var, eps)


def _reference_feature_fuse(x, params):
    """Pure-JAX reference (lax.conv) for a correctness sanity check."""
    w11, w33, wdi, gamma, beta, mean, var, eps = params
    dn = ("NCHW", "OIHW", "NCHW")
    y1 = jax.lax.conv_general_dilated(x, w11, (1, 1), "VALID",
                                      dimension_numbers=dn)
    y2 = jax.lax.conv_general_dilated(x, w33, (1, 1), ((1, 1), (1, 1)),
                                      dimension_numbers=dn)
    y3 = jax.lax.conv_general_dilated(x, wdi, (1, 1), ((2, 2), (2, 2)),
                                      rhs_dilation=(2, 2),
                                      dimension_numbers=dn)
    y = y1 + y2 + y3
    inv = (gamma / jnp.sqrt(var + eps))[None, :, None, None]
    return (y - mean[None, :, None, None]) * inv + beta[None, :, None, None]


if __name__ == "__main__":
    key = jax.random.PRNGKey(0)
    kx, kp = jax.random.split(key)

    N, Cin, H, W = 2, 4, 16, 16
    Cout = 8

    x = jax.random.normal(kx, (N, Cin, H, W), jnp.float32)
    params = init_params(kp, Cin, Cout)

    out = jax.block_until_ready(feature_fuse(x, params))
    ref = _reference_feature_fuse(x, params)

    assert out.shape == (N, Cout, H, W)
    # bf16 MXU operands (f32 accumulation): tolerance loosened vs. f32 reference.
    max_err = float(jnp.max(jnp.abs(out - ref)))
    assert jnp.allclose(out, ref, atol=1e-1, rtol=1e-1), (
        "mismatch vs reference, max err %e" % max_err)

    print("KERNEL_OK")
</pallas_src>

<mosaic_0001>
module attributes {stable_mosaic.version = 11 : i64} {
  func.func @_feature_fuse_kernel(%arg0: i32, %arg1: memref<1x8x256xf32, #tpu.memory_space<vmem>>, %arg2: memref<8x144xbf16, #tpu.memory_space<vmem>>, %arg3: memref<24x256xf32, #tpu.memory_space<vmem>>, %arg4: memref<1x8x256xf32, #tpu.memory_space<vmem>>, %arg5: memref<8x512xf32, #tpu.memory_space<vmem>>, %arg6: memref<144x256xbf16, #tpu.memory_space<vmem>>) attributes {dimension_semantics = [#tpu.dimension_semantics<parallel>], iteration_bounds = array<i64: 2>, scalar_prefetch = 0 : i64, scratch_operands = 2 : i64, tpu.core_type = #tpu.core_type<tc>, window_params = [{transform_indices = @transform_0, window_bounds = array<i64: 1, 8, 256>}, {pipeline_mode = #tpu.pipeline_mode<synchronous>, transform_indices = @transform_1, window_bounds = array<i64: 8, 144>}, {pipeline_mode = #tpu.pipeline_mode<synchronous>, transform_indices = @transform_2, window_bounds = array<i64: 24, 256>}, {transform_indices = @transform_3, window_bounds = array<i64: 1, 8, 256>}]} {
    %cst = arith.constant 0.000000e+00 : f32
    %0 = vector.broadcast %cst : f32 to vector<8x128xf32>
    %c0 = arith.constant 0 : index
    %c0_0 = arith.constant 0 : index
    %1 = vector.load %arg5[%c0, %c0_0] : memref<8x512xf32, #tpu.memory_space<vmem>>, vector<8x128xf32>
    tpu.vector_store %arg5[%c0, %c0_0], %0 {strides = array<i32>} : memref<8x512xf32, #tpu.memory_space<vmem>>, vector<8x128xf32>,
    %c0_1 = arith.constant 0 : index
    %c384 = arith.constant 384 : index
    %2 = vector.load %arg5[%c0_1, %c384] : memref<8x512xf32, #tpu.memory_space<vmem>>, vector<8x128xf32>
    tpu.vector_store %arg5[%c0_1, %c384], %0 {strides = array<i32>} : memref<8x512xf32, #tpu.memory_space<vmem>>, vector<8x128xf32>,
    %c0_2 = arith.constant 0 : index
    %c0_3 = arith.constant 0 : index
    %c0_4 = arith.constant 0 : index
    %3 = vector.load %arg1[%c0_2, %c0_3, %c0_4] : memref<1x8x256xf32, #tpu.memory_space<vmem>>, vector<1x8x256xf32>
    %4 = vector.shape_cast %3 : vector<1x8x256xf32> to vector<8x256xf32>
    %c0_5 = arith.constant 0 : index
    %c128 = arith.constant 128 : index
    %5 = vector.load %arg5[%c0_5, %c128] : memref<8x512xf32, #tpu.memory_space<vmem>>, vector<8x256xf32>
    tpu.vector_store %arg5[%c0_5, %c128], %4 {strides = array<i32>} : memref<8x512xf32, #tpu.memory_space<vmem>>, vector<8x256xf32>,
    %c0_6 = arith.constant 0 : index
    %c94 = arith.constant 94 : index
    %6 = vector.load %arg5[%c0_6, %c94] : memref<8x512xf32, #tpu.memory_space<vmem>>, vector<8x256xf32>
    %c0_7 = arith.constant 0 : index
    %c0_8 = arith.constant 0 : index
    %7 = vector.load %arg3[%c0_7, %c0_8] : memref<24x256xf32, #tpu.memory_space<vmem>>, vector<1x256xf32>
    %8 = vector.broadcast %7 : vector<1x256xf32> to vector<8x256xf32>
    %9 = arith.mulf %6, %8 : vector<8x256xf32>
    %c0_9 = arith.constant 0 : index
    %c96 = arith.constant 96 : index
    %10 = vector.load %arg5[%c0_9, %c96] : memref<8x512xf32, #tpu.memory_space<vmem>>, vector<8x256xf32>
    %c1 = arith.constant 1 : index
    %c0_10 = arith.constant 0 : index
    %11 = vector.load %arg3[%c1, %c0_10] : memref<24x256xf32, #tpu.memory_space<vmem>>, vector<1x256xf32>
    %12 = vector.broadcast %11 : vector<1x256xf32> to vector<8x256xf32>
    %13 = arith.mulf %10, %12 : vector<8x256xf32>
    %14 = tpu.concatenate %9, %13 in 0 : vector<8x256xf32>, vector<8x256xf32> -> vector<16x256xf32>
    %15 = arith.truncf %14 : vector<16x256xf32> to vector<16x256xbf16>
    %c0_11 = arith.constant 0 : index
    %c0_12 = arith.constant 0 : index
    %16 = vector.load %arg6[%c0_11, %c0_12] : memref<144x256xbf16, #tpu.memory_space<vmem>>, vector<16x256xbf16>
    tpu.vector_store %arg6[%c0_11, %c0_12], %15 {strides = array<i32>} : memref<144x256xbf16, #tpu.memory_space<vmem>>, vector<16x256xbf16>,
    %c0_13 = arith.constant 0 : index
    %c98 = arith.constant 98 : index
    %17 = vector.load %arg5[%c0_13, %c98] : memref<8x512xf32, #tpu.memory_space<vmem>>, vector<8x256xf32>
    %c2 = arith.constant 2 : index
    %c0_14 = arith.constant 0 : index
    %18 = vector.load %arg3[%c2, %c0_14] : memref<24x256xf32, #tpu.memory_space<vmem>>, vector<1x256xf32>
    %19 = vector.broadcast %18 : vector<1x256xf32> to vector<8x256xf32>
    %20 = arith.mulf %17, %19 : vector<8x256xf32>
    %c0_15 = arith.constant 0 : index
    %c111 = arith.constant 111 : index
    %21 = vector.load %arg5[%c0_15, %c111] : memref<8x512xf32, #tpu.memory_space<vmem>>, vector<8x256xf32>
    %c3 = arith.constant 3 : index
    %c0_16 = arith.constant 0 : index
    %22 = vector.load %arg3[%c3, %c0_16] : memref<24x256xf32, #tpu.memory_space<vmem>>, vector<1x256xf32>
    %23 = vector.broadcast %22 : vector<1x256xf32> to vector<8x256xf32>
    %24 = arith.mulf %21, %23 : vector<8x256xf32>
    %25 = tpu.concatenate %20, %24 in 0 : vector<8x256xf32>, vector<8x256xf32> -> vector<16x256xf32>
    %26 = arith.truncf %25 : vector<16x256xf32> to vector<16x256xbf16>
    %c16 = arith.constant 16 : index
    %c0_17 = arith.constant 0 : index
    %27 = vector.load %arg6[%c16, %c0_17] : memref<144x256xbf16, #tpu.memory_space<vmem>>, vector<16x256xbf16>
    tpu.vector_store %arg6[%c16, %c0_17], %26 {strides = array<i32>} : memref<144x256xbf16, #tpu.memory_space<vmem>>, vector<16x256xbf16>,
    %c0_18 = arith.constant 0 : index
    %c112 = arith.constant 112 : index
    %28 = vector.load %arg5[%c0_18, %c112] : memref<8x512xf32, #tpu.memory_space<vmem>>, vector<8x256xf32>
    %c4 = arith.constant 4 : index
    %c0_19 = arith.constant 0 : index
    %29 = vector.load %arg3[%c4, %c0_19] : memref<24x256xf32, #tpu.memory_space<vmem>>, vector<1x256xf32>
    %30 = vector.broadcast %29 : vector<1x256xf32> to vector<8x256xf32>
    %31 = arith.mulf %28, %30 : vector<8x256xf32>
    %c0_20 = arith.constant 0 : index
    %c113 = arith.constant 113 : index
    %32 = vector.load %arg5[%c0_20, %c113] : memref<8x512xf32, #tpu.memory_space<vmem>>, vector<8x256xf32>
    %c5 = arith.constant 5 : index
    %c0_21 = arith.constant 0 : index
    %33 = vector.load %arg3[%c5, %c0_21] : memref<24x256xf32, #tpu.memory_space<vmem>>, vector<1x256xf32>
    %34 = vector.broadcast %33 : vector<1x256xf32> to vector<8x256xf32>
    %35 = arith.mulf %32, %34 : vector<8x256xf32>
    %36 = tpu.concatenate %31, %35 in 0 : vector<8x256xf32>, vector<8x256xf32> -> vector<16x256xf32>
    %37 = arith.truncf %36 : vector<16x256xf32> to vector<16x256xbf16>
    %c32 = arith.constant 32 : index
    %c0_22 = arith.constant 0 : index
    %38 = vector.load %arg6[%c32, %c0_22] : memref<144x256xbf16, #tpu.memory_space<vmem>>, vector<16x256xbf16>
    tpu.vector_store %arg6[%c32, %c0_22], %37 {strides = array<i32>} : memref<144x256xbf16, #tpu.memory_space<vmem>>, vector<16x256xbf16>,
    %c0_23 = arith.constant 0 : index
    %c126 = arith.constant 126 : index
    %39 = vector.load %arg5[%c0_23, %c126] : memref<8x512xf32, #tpu.memory_space<vmem>>, vector<8x256xf32>
    %c6 = arith.constant 6 : index
    %c0_24 = arith.constant 0 : index
    %40 = vector.load %arg3[%c6, %c0_24] : memref<24x256xf32, #tpu.memory_space<vmem>>, vector<1x256xf32>
    %41 = vector.broadcast %40 : vector<1x256xf32> to vector<8x256xf32>
    %42 = arith.mulf %39, %41 : vector<8x256xf32>
    %c0_25 = arith.constant 0 : index
    %c127 = arith.constant 127 : index
    %43 = vector.load %arg5[%c0_25, %c127] : memref<8x512xf32, #tpu.memory_space<vmem>>, vector<8x256xf32>
    %c7 = arith.constant 7 : index
    %c0_26 = arith.constant 0 : index
    %44 = vector.load %arg3[%c7, %c0_26] : memref<24x256xf32, #tpu.memory_space<vmem>>, vector<1x256xf32>
    %45 = vector.broadcast %44 : vector<1x256xf32> to vector<8x256xf32>
    %46 = arith.mulf %43, %45 : vector<8x256xf32>
    %47 = tpu.concatenate %42, %46 in 0 : vector<8x256xf32>, vector<8x256xf32> -> vector<16x256xf32>
    %48 = arith.truncf %47 : vector<16x256xf32> to vector<16x256xbf16>
    %c48 = arith.constant 48 : index
    %c0_27 = arith.constant 0 : index
    %49 = vector.load %arg6[%c48, %c0_27] : memref<144x256xbf16, #tpu.memory_space<vmem>>, vector<16x256xbf16>
    tpu.vector_store %arg6[%c48, %c0_27], %48 {strides = array<i32>} : memref<144x256xbf16, #tpu.memory_space<vmem>>, vector<16x256xbf16>,
    %c0_28 = arith.constant 0 : index
    %c128_29 = arith.constant 128 : index
    %50 = vector.load %arg5[%c0_28, %c128_29] : memref<8x512xf32, #tpu.memory_space<vmem>>, vector<8x256xf32>
    %c0_30 = arith.constant 0 : index
    %c129 = arith.constant 129 : index
    %51 = vector.load %arg5[%c0_30, %c129] : memref<8x512xf32, #tpu.memory_space<vmem>>, vector<8x256xf32>
    %c9 = arith.constant 9 : index
    %c0_31 = arith.constant 0 : index
    %52 = vector.load %arg3[%c9, %c0_31] : memref<24x256xf32, #tpu.memory_space<vmem>>, vector<1x256xf32>
    %53 = vector.broadcast %52 : vector<1x256xf32> to vector<8x256xf32>
    %54 = arith.mulf %51, %53 : vector<8x256xf32>
    %55 = tpu.concatenate %50, %54 in 0 : vector<8x256xf32>, vector<8x256xf32> -> vector<16x256xf32>
    %56 = arith.truncf %55 : vector<16x256xf32> to vector<16x256xbf16>
    %c64 = arith.constant 64 : index
    %c0_32 = arith.constant 0 : index
    %57 = vector.load %arg6[%c64, %c0_32] : memref<144x256xbf16, #tpu.memory_space<vmem>>, vector<16x256xbf16>
    tpu.vector_store %arg6[%c64, %c0_32], %56 {strides = array<i32>} : memref<144x256xbf16, #tpu.memory_space<vmem>>, vector<16x256xbf16>,
    %c0_33 = arith.constant 0 : index
    %c130 = arith.constant 130 : index
    %58 = vector.load %arg5[%c0_33, %c130] : memref<8x512xf32, #tpu.memory_space<vmem>>, vector<8x256xf32>
    %c10 = arith.constant 10 : index
    %c0_34 = arith.constant 0 : index
    %59 = vector.load %arg3[%c10, %c0_34] : memref<24x256xf32, #tpu.memory_space<vmem>>, vector<1x256xf32>
    %60 = vector.broadcast %59 : vector<1x256xf32> to vector<8x256xf32>
    %61 = arith.mulf %58, %60 : vector<8x256xf32>
    %c0_35 = arith.constant 0 : index
    %c143 = arith.constant 143 : index
    %62 = vector.load %arg5[%c0_35, %c143] : memref<8x512xf32, #tpu.memory_space<vmem>>, vector<8x256xf32>
    %c11 = arith.constant 11 : index
    %c0_36 = arith.constant 0 : index
    %63 = vector.load %arg3[%c11, %c0_36] : memref<24x256xf32, #tpu.memory_space<vmem>>, vector<1x256xf32>
    %64 = vector.broadcast %63 : vector<1x256xf32> to vector<8x256xf32>
    %65 = arith.mulf %62, %64 : vector<8x256xf32>
    %66 = tpu.concatenate %61, %65 in 0 : vector<8x256xf32>, vector<8x256xf32> -> vector<16x256xf32>
    %67 = arith.truncf %66 : vector<16x256xf32> to vector<16x256xbf16>
    %c80 = arith.constant 80 : index
    %c0_37 = arith.constant 0 : index
    %68 = vector.load %arg6[%c80, %c0_37] : memref<144x256xbf16, #tpu.memory_space<vmem>>, vector<16x256xbf16>
    tpu.vector_store %arg6[%c80, %c0_37], %67 {strides = array<i32>} : memref<144x256xbf16, #tpu.memory_space<vmem>>, vector<16x256xbf16>,
    %c0_38 = arith.constant 0 : index
    %c144 = arith.constant 144 : index
    %69 = vector.load %arg5[%c0_38, %c144] : memref<8x512xf32, #tpu.memory_space<vmem>>, vector<8x256xf32>
    %c12 = arith.constant 12 : index
    %c0_39 = arith.constant 0 : index
    %70 = vector.load %arg3[%c12, %c0_39] : memref<24x256xf32, #tpu.memory_space<vmem>>, vector<1x256xf32>
    %71 = vector.broadcast %70 : vector<1x256xf32> to vector<8x256xf32>
    %72 = arith.mulf %69, %71 : vector<8x256xf32>
    %c0_40 = arith.constant 0 : index
    %c145 = arith.constant 145 : index
    %73 = vector.load %arg5[%c0_40, %c145] : memref<8x512xf32, #tpu.memory_space<vmem>>, vector<8x256xf32>
    %c13 = arith.constant 13 : index
    %c0_41 = arith.constant 0 : index
    %74 = vector.load %arg3[%c13, %c0_41] : memref<24x256xf32, #tpu.memory_space<vmem>>, vector<1x256xf32>
    %75 = vector.broadcast %74 : vector<1x256xf32> to vector<8x256xf32>
    %76 = arith.mulf %73, %75 : vector<8x256xf32>
    %77 = tpu.concatenate %72, %76 in 0 : vector<8x256xf32>, vector<8x256xf32> -> vector<16x256xf32>
    %78 = arith.truncf %77 : vector<16x256xf32> to vector<16x256xbf16>
    %c96_42 = arith.constant 96 : index
    %c0_43 = arith.constant 0 : index
    %79 = vector.load %arg6[%c96_42, %c0_43] : memref<144x256xbf16, #tpu.memory_space<vmem>>, vector<16x256xbf16>
    tpu.vector_store %arg6[%c96_42, %c0_43], %78 {strides = array<i32>} : memref<144x256xbf16, #tpu.memory_space<vmem>>, vector<16x256xbf16>,
    %c0_44 = arith.constant 0 : index
    %c158 = arith.constant 158 : index
    %80 = vector.load %arg5[%c0_44, %c158] : memref<8x512xf32, #tpu.memory_space<vmem>>, vector<8x256xf32>
    %c14 = arith.constant 14 : index
    %c0_45 = arith.constant 0 : index
    %81 = vector.load %arg3[%c14, %c0_45] : memref<24x256xf32, #tpu.memory_space<vmem>>, vector<1x256xf32>
    %82 = vector.broadcast %81 : vector<1x256xf32> to vector<8x256xf32>
    %83 = arith.mulf %80, %82 : vector<8x256xf32>
    %c0_46 = arith.constant 0 : index
    %c160 = arith.constant 160 : index
    %84 = vector.load %arg5[%c0_46, %c160] : memref<8x512xf32, #tpu.memory_space<vmem>>, vector<8x256xf32>
    %c15 = arith.constant 15 : index
    %c0_47 = arith.constant 0 : index
    %85 = vector.load %arg3[%c15, %c0_47] : memref<24x256xf32, #tpu.memory_space<vmem>>, vector<1x256xf32>
    %86 = vector.broadcast %85 : vector<1x256xf32> to vector<8x256xf32>
    %87 = arith.mulf %84, %86 : vector<8x256xf32>
    %88 = tpu.concatenate %83, %87 in 0 : vector<8x256xf32>, vector<8x256xf32> -> vector<16x256xf32>
    %89 = arith.truncf %88 : vector<16x256xf32> to vector<16x256xbf16>
    %c112_48 = arith.constant 112 : index
    %c0_49 = arith.constant 0 : index
    %90 = vector.load %arg6[%c112_48, %c0_49] : memref<144x256xbf16, #tpu.memory_space<vmem>>, vector<16x256xbf16>
    tpu.vector_store %arg6[%c112_48, %c0_49], %89 {strides = array<i32>} : memref<144x256xbf16, #tpu.memory_space<vmem>>, vector<16x256xbf16>,
    %c0_50 = arith.constant 0 : index
    %c162 = arith.constant 162 : index
    %91 = vector.load %arg5[%c0_50, %c162] : memref<8x512xf32, #tpu.memory_space<vmem>>, vector<8x256xf32>
    %c16_51 = arith.constant 16 : index
    %c0_52 = arith.constant 0 : index
    %92 = vector.load %arg3[%c16_51, %c0_52] : memref<24x256xf32, #tpu.memory_space<vmem>>, vector<1x256xf32>
    %93 = vector.broadcast %92 : vector<1x256xf32> to vector<8x256xf32>
    %94 = arith.mulf %91, %93 : vector<8x256xf32>
    %cst_53 = arith.constant 1.000000e+00 : f32
    %95 = vector.broadcast %cst_53 : f32 to vector<8x256xf32>
    %96 = tpu.concatenate %94, %95 in 0 : vector<8x256xf32>, vector<8x256xf32> -> vector<16x256xf32>
    %97 = arith.truncf %96 : vector<16x256xf32> to vector<16x256xbf16>
    %c128_54 = arith.constant 128 : index
    %c0_55 = arith.constant 0 : index
    %98 = vector.load %arg6[%c128_54, %c0_55] : memref<144x256xbf16, #tpu.memory_space<vmem>>, vector<16x256xbf16>
    tpu.vector_store %arg6[%c128_54, %c0_55], %97 {strides = array<i32>} : memref<144x256xbf16, #tpu.memory_space<vmem>>, vector<16x256xbf16>,
    %c0_56 = arith.constant 0 : index
    %c0_57 = arith.constant 0 : index
    %99 = vector.load %arg2[%c0_56, %c0_57] : memref<8x144xbf16, #tpu.memory_space<vmem>>, vector<8x144xbf16>
    %c0_58 = arith.constant 0 : index
    %c0_59 = arith.constant 0 : index
    %100 = vector.load %arg6[%c0_58, %c0_59] : memref<144x256xbf16, #tpu.memory_space<vmem>>, vector<144x256xbf16>
    %cst_60 = arith.constant dense<0.000000e+00> : vector<8x256xf32>
    %101 = tpu.matmul %99, %100, %cst_60 {dimension_numbers = #tpu.dot_dimension_numbers<[1], [0], [0], [1], [0, 0, 1, 1], [], []>} : vector<8x144xbf16>, vector<144x256xbf16>, vector<8x256xf32> -> vector<8x256xf32>
    %c0_61 = arith.constant 0 : index
    %c0_62 = arith.constant 0 : index
    %c0_63 = arith.constant 0 : index
    %102 = vector.load %arg4[%c0_61, %c0_62, %c0_63] : memref<1x8x256xf32, #tpu.memory_space<vmem>>, vector<1x8x256xf32>
    %103 = vector.shape_cast %102 : vector<1x8x256xf32> to vector<8x256xf32>
    %104 = vector.shape_cast %101 : vector<8x256xf32> to vector<1x8x256xf32>
    tpu.vector_store %arg4[%c0_61, %c0_62, %c0_63], %104 {strides = array<i32>} : memref<1x8x256xf32, #tpu.memory_space<vmem>>, vector<1x8x256xf32>,
    return
  }
  func.func @transform_0(%arg0: i32) -> (i32, i32, i32) {
    %c0_i32 = arith.constant 0 : i32
    %c0_i32_0 = arith.constant 0 : i32
    %c0_i32_1 = arith.constant 0 : i32
    return %arg0, %c0_i32, %c0_i32_0 : i32, i32, i32
  }
  func.func @transform_1(%arg0: i32) -> (i32, i32) {
    %c0_i32 = arith.constant 0 : i32
    %c0_i32_0 = arith.constant 0 : i32
    %c0_i32_1 = arith.constant 0 : i32
    return %c0_i32, %c0_i32_0 : i32, i32
  }
  func.func @transform_2(%arg0: i32) -> (i32, i32) {
    %c0_i32 = arith.constant 0 : i32
    %c0_i32_0 = arith.constant 0 : i32
    %c0_i32_1 = arith.constant 0 : i32
    return %c0_i32, %c0_i32_0 : i32, i32
  }
  func.func @transform_3(%arg0: i32) -> (i32, i32, i32) {
    %c0_i32 = arith.constant 0 : i32
    %c0_i32_0 = arith.constant 0 : i32
    %c0_i32_1 = arith.constant 0 : i32
    return %arg0, %c0_i32, %c0_i32_0 : i32, i32, i32
  }
}

</mosaic_0001>

<bundles_post_ra>
// kernel: tpu_custom_call.1
= control target key start
LH: loop header
LB: loop body
LE: loop exit
PB: predicated region body
PF: predicated region fallthrough
CT: control target
= control target key end

     0   :  { %8 = vsyncpa [#allocation5], 0  ;;  %s1900_s0 = inlined_call_operand.hbm [shape: f32[2,8,256], index: 0, kind: input, shape index: {}]   ;;  %s1901_s1 = inlined_call_operand.hbm [shape: bf16[8,144], index: 1, kind: input, shape index: {}]   ;;  %s1902_s2 = inlined_call_operand.hbm [shape: f32[24,256], index: 2, kind: input, shape index: {}]   ;;  %s1903_s3 = inlined_call_operand.hbm [shape: f32[2,8,256], index: 3, kind: output, shape index: {}]  }
   0x1   :  { %10 = vsyncpa [#allocation5 + $0x1], 0 }
   0x2   :  { %11 = vsyncpa [#allocation8], 0 }
   0x3   :  { %12 = vsyncpa [#allocation6], 0 }
   0x4   :  { %14 = vsyncpa [#allocation6 + $0x1], 0  ;;  %s1424_s12 = smov 0   ;;  %s1426_s13 = smov 0  }
   0x5   :  { %s1428_s14 = smov 0   ;;  %s1430_s15 = smov 0  }
   0x6 LB: > { %s1445_s16 = sadd.s32 4294967295, %s1378_s15   ;;  %s1060_s17 = sadd.s32 4294967294, %s1378_s15   ;;  %s1378_s15 = sphi %s1430_s15, %s1923_s15   ;;  %s1374_s14 = sphi %s1428_s14, %s1922_s14   ;;  %s1370_s13 = sphi %s1426_s13, %s1921_s13   ;;  %s1366_s12 = sphi %s1424_s12, %s1920_s12  }
   0x7   : > { %p40_p0 = scmp.ne.s32.totalorder %s1370_s13, %s1366_s12  ;;  %p1904_p1 = scmp.eq.s32.totalorder %s1445_s16, 0 }
   0x8   : > { %p112_p3 = scmp.eq.s32.totalorder %s1060_s17, 1  ;;  %p1061_p5 = scmp.ge.s32.totalorder %s1378_s15, 1 }
   0x9   : > { %p1454_p4 = por %p1904_p1, %p40_p0  ;;  %p119_p7 = scmp.lt.s32.totalorder %s1378_s15, 3 }
   0xa   : > { %p1459_p6 = por %p112_p3, %p40_p0  ;;  %s1380_s21 = smov [#allocation7]  }
   0xb   : > { %s1907_s18 = scalar_select %p1454_p4, 1, 0 }
   0xc   : > { %s1908_s19 = scalar_select %p1459_p6, 1, 0 }
   0xd   : > { %p1464_p8 = pnand %p1061_p5, %p119_p7  ;;  %s132_s22 = sshll.u32 %s1380_s21, 4  ;;  %s133_s22 = int_to_ptr.vmem [resolvable:$true] %s132_s22 }
   0xe   : > { %s1381_s23 = smov [#allocation9]   ;;  %s1222_s28 = scalar_lea.hbm %s1901_s1, 128 }
   0xf   : > { %s1909_s20 = scalar_select %p1464_p8, 1, 0 }
  0x10   : > { %p1095_p10 = pneg %p1464_p8  ;;  %s142_s24 = sshll.u32 %s1381_s23, 4  ;;  %s1477_s24 = int_to_ptr.vmem [resolvable:$true] %s142_s24 }
  0x11   : > { %p1223_p12 = scmp.ne.s32.totalorder %s1901_s1, %s1222_s28  ;;  %p1229_p5 = scmp.lt.u32.totalorder %s1222_s28, %s1901_s1 }
  0x12   : > { %p1473_p11 = pnand %p1095_p10, %p1904_p1 }
  0x14   : > { %p1224_p13 = pneg %p1473_p11 }
  0x16   : > { %p1225_p0 = pnand %p1224_p13, %p1223_p12 }
  0x18   : > { %p1226_p3 = pneg %p1225_p0 }
  0x1a   : > { %p1231_p7 = pnand %p1229_p5, %p1226_p3 }
  0x1c   : > { %1234 = shalt.err (!%p1231_p7)
}
  0x1d   : > { %s1235_s6 = scalar_lea.vmem %s133_s22, 128  ;;  %p1243_p2 = scmp.lt.s32.totalorder %s133_s22, %s133_s22 }
  0x1e   : > { %p1236_p10 = scmp.ne.s32.totalorder %s133_s22, %s1235_s6  ;;  %p1244_p6 = scmp.lt.s32.totalorder %s1235_s6, %s1235_s6 }
  0x20   : > { %p1238_p9 = pnand %p1236_p10, %p1224_p13  ;;  %p1245_p4 = por %p1244_p6, %p1243_p2 }
  0x22   : > { %p1239_p1 = pneg %p1238_p9 }
  0x24   : > { %p1246_p8 = pnand %p1245_p4, %p1239_p1 }
  0x26   : > { %1249 = shalt.err (!%p1246_p8)
}
  0x27   : > { %1098 = dma.hbm_to_vmem [thread:$0]  (!%p1473_p11), %s1901_s1, 128, %s133_s22, [#allocation8]  }
  0x28   : > { %s1250_s11 = scalar_lea.hbm %s1902_s2, 768 }
  0x29   : > { %p1251_p9 = scmp.ne.s32.totalorder %s1902_s2, %s1250_s11  ;;  %p1257_p4 = scmp.lt.u32.totalorder %s1250_s11, %s1902_s2 }
  0x2b   : > { %p1253_p2 = pnand %p1251_p9, %p1224_p13 }
  0x2d   : > { %p1254_p1 = pneg %p1253_p2 }
  0x2f   : > { %p1259_p6 = pnand %p1257_p4, %p1254_p1 }
  0x31   : > { %1262 = shalt.err (!%p1259_p6)
}
  0x32   : > { %s1263_s22 = scalar_lea.vmem %s1477_s24, 768  ;;  %p1271_p3 = scmp.lt.s32.totalorder %s1477_s24, %s1477_s24 }
  0x33   : > { %p1264_p8 = scmp.ne.s32.totalorder %s1477_s24, %s1263_s22  ;;  %p1272_p5 = scmp.lt.s32.totalorder %s1263_s22, %s1263_s22 }
  0x35   : > { %p1266_p12 = pnand %p1264_p8, %p1224_p13  ;;  %p1273_p7 = por %p1272_p5, %p1271_p3 }
  0x37   : > { %p1267_p0 = pneg %p1266_p12 }
  0x39   : > { %p1274_p10 = pnand %p1273_p7, %p1267_p0 }
  0x3b   : > { %1277 = shalt.err (!%p1274_p10)
}
  0x3c   : > { %s1382_s27 = smov 256   ;;  %s1383_s28 = smov 16  }
  0x3d   : > { %1101 = dma.hbm_to_vmem [thread:$0]  (!%p1473_p11), %s1902_s2, 768, %s1477_s24, [#allocation8], %s1382_s27, %s1382_s27, %s1383_s28  }
  0x3e   : > { %s1527_s4 = sadd.s32 1, %s1378_s15   ;;  %s27_s5 = sadd.s32 1, %s1374_s14 }
  0x3f   : > { %s24_s6 = ssub.s32 %s1378_s15, %s1527_s4  ;;  %p34_p13 = scmp.ne.s32.totalorder %s1374_s14, %s1370_s13 }
  0x40   : > { %p25_p9 = scmp.eq.s32.totalorder %s24_s6, 0  ;;  %p35_p2 = scmp.eq.s32.totalorder %s1378_s15, 0 }
  0x41   : > { %p1911_p1 = scmp.eq.s32.totalorder %s1445_s16, 1  ;;  %p1112_p6 = scmp.lt.s32.totalorder %s1378_s15, 2 }
  0x42   : > { %s1543_s8 = scalar_select %p25_p9, %s1374_s14, %s27_s5  }
  0x43   : > { %p1537_p4 = por %p1911_p1, %p34_p13  ;;  %p36_p8 = por %p35_p2, %p34_p13 }
  0x44   : > { %s156_s25 = sand.u32 1, %s1374_s14   ;;  %s1081_s24 = sshll.u32 %s1378_s15, 8 }
  0x45   : > { %s1065_s9 = sshll.u32 %s156_s25, 4  ;;  %s1550_s17 = scalar_lea.hbm %s1900_s0, %s1081_s24 }
  0x46   : > { %s160_s21 = scalar_lea.vmem [#allocation4], %s1065_s9  ;;  %p1554_p11 = pnand %p1112_p6, %p36_p8 }
  0x47   : > { %s168_s23 = sshll.u32 %s160_s21, 4  ;;  %s157_s22 = scalar_lea.sflag [#allocation5], %s156_s25  ;;  %s1552_s23 = int_to_ptr.vmem [resolvable:$true] %s168_s23 }
  0x48   : > { %s1278_s27 = scalar_lea.hbm %s1550_s17, 256  ;;  %p1280_p0 = pneg %p1554_p11 }
  0x49   : > { %p1279_p12 = scmp.ne.s32.totalorder %s1550_s17, %s1278_s27  ;;  %s1283_s30 = scalar_lea.hbm %s1900_s0, 512 }
  0x4a   : > { %p1284_p7 = scmp.lt.u32.totalorder %s1550_s17, %s1900_s0  ;;  %p1285_p10 = scmp.lt.u32.totalorder %s1283_s30, %s1278_s27 }
  0x4b   : > { %p1281_p3 = pnand %p1280_p0, %p1279_p12  ;;  %p1287_p9 = scmp.lt.u32.totalorder %s1278_s27, %s1550_s17 }
  0x4c   : > { %p1286_p13 = por %p1285_p10, %p1284_p7 }
  0x4d   : > { %p1282_p5 = pneg %p1281_p3 }
  0x4e   : > { %p1288_p2 = por %p1287_p9, %p1286_p13 }
  0x50   : > { %p1289_p1 = pnand %p1288_p2, %p1282_p5 }
  0x52   : > { %1292 = shalt.err (!%p1289_p1)
}
  0x53   : > { %s1293_s25 = scalar_lea.vmem %s1552_s23, 256  ;;  %s1384_s9 = smov [#allocation4]  }
  0x54   : > { %p1294_p6 = scmp.ne.s32.totalorder %s1552_s23, %s1293_s25  ;;  %s1298_s24 = sshll.u32 %s1384_s9, 4  ;;  %s1299_s24 = int_to_ptr.vmem [resolvable:$false] %s1298_s24 }
  0x55   : > { %s1300_s10 = scalar_lea.vmem %s1299_s24, 512  ;;  %p1301_p3 = scmp.lt.s32.totalorder %s1552_s23, %s1299_s24 }
  0x56   : > { %p1296_p8 = pnand %p1294_p6, %p1280_p0  ;;  %p1302_p7 = scmp.lt.s32.totalorder %s1300_s10, %s1293_s25 }
  0x58   : > { %p1297_p12 = pneg %p1296_p8  ;;  %p1303_p10 = por %p1302_p7, %p1301_p3 }
  0x5a   : > { %p1304_p13 = pnand %p1303_p10, %p1297_p12 }
  0x5c   : > { %1307 = shalt.err (!%p1304_p13)
}
  0x5d   : > { %1105 = dma.hbm_to_vmem [thread:$0]  (!%p1554_p11), %s1550_s17, 256, %s1552_s23, %s157_s22  }
  0x5e   : > { %p1914_p5 = scmp.ne.s32.totalorder %s1909_s20, 0 }
  0x5f   : > { %s1586_s11 = sand.u32 (!%p1914_p5), 1, %s1370_s13   ;;  %p1915_p0 = scmp.ne.s32.totalorder (!%p1914_p5), %s1907_s18, 0 }
  0x60   : > { %177 = sbr.rel (%p1914_p5) target bundleno = 765 (0x2fd), region = 32  ;;  %s1069_s21 = sshll.u32 (!%p1914_p5), %s1586_s11, 4 }
  0x61   : > { %s180_s27 = scalar_lea.sflag (!%p1914_p5), [#allocation5], %s1586_s11  ;;  %s1592_s28 = scalar_lea.vmem (!%p1914_p5), [#allocation4], %s1069_s21 }
  0x67   : > { %1353 = dma.done.wait (%p1915_p0), %s180_s27, 256  }
  0x68   : > { %1355 = vsyncadd (%p1915_p0), %s180_s27, 4294967040  ;;  %p1916_p11 = scmp.eq.s32.totalorder %s1445_s16, 0 }
  0x6a   : > { %1357 = dma.done.wait (%p1916_p11), [#allocation8], 896   ;;  %p1917_p9 = pmov %p1916_p11 }
  0x6b   : > { %v226_v0 = vlaneseq  ;;  %v330_v4 = vld [vmem:[#allocation9 + $0x3] ss:$8 sm:$0x3]  ;;  %v247_v5 = vld [vmem:[#allocation9 + $0x1] ss:$8 sm:$0x3] }
  0x6c   : > { %1359 = vsyncadd (%p1917_p9), [#allocation8], 4294966400  ;;  %s1385_s18 = smov 111   ;;  %s1386_s20 = smov 96   ;;  %vm261_vm0 = vcmask 785408   ;;  %v1649_v50 = vld [vmem:[%s1592_s28] sm:$0xff] }
  0x6d   : > { %v227_v1 = vshrl.u32 %v226_v0, 7  ;;  %v413_v10 = vld [vmem:[#allocation9 + $0x5] ss:$8 sm:$0x3]  ;;  %s1387_s17 = smov 113   ;;  %s1388_s23 = smov 127  }
  0x6e   : > { %v495_v13 = vld [vmem:[#allocation9 + $0x7] ss:$8 sm:$0x3]  ;;  %v621_v16 = vld [vmem:[#allocation9 + $0x13] ss:$8 sm:$0x3] }
  0x6f   : > { %v1602_v2 = vsub.s32 0, %v227_v1  ;;  %v1604_v3 = vsub.s32 1, %v227_v1  ;;  %v703_v19 = vld [vmem:[#allocation9 + $0x15] ss:$8 sm:$0x3]  ;;  %s1389_s26 = smov 15  }
  0x70   : > { %v1618_v20 = vld [vmem:[#allocation9 + $0x12] ss:$8 sm:$0x3]  ;;  %v785_v24 = vld [vmem:[#allocation9 + $0x17] ss:$8 sm:$0x3] }
  0x71   : > { %v335_v6 = vrot.slane %v330_v4, %v1602_v2  ;;  %v252_v7 = vrot.slane %v247_v5, %v1602_v2  ;;  %v339_v8 = vrot.slane %v330_v4, %v1604_v3  ;;  %v256_v9 = vrot.slane %v247_v5, %v1604_v3  ;;  %s1390_s22 = smov 17   ;;  %v224_v27 = vld [vmem:[#allocation9] ss:$8 sm:$0x3]  ;;  %s1391_s29 = smov 32  }
  0x72   : > { %v422_v11 = vrot.slane %v413_v10, %v1604_v3  ;;  %v418_v12 = vrot.slane %v413_v10, %v1602_v2  ;;  %v504_v14 = vrot.slane %v495_v13, %v1604_v3  ;;  %v500_v15 = vrot.slane %v495_v13, %v1602_v2  ;;  %v307_v30 = vld [vmem:[#allocation9 + $0x2] ss:$8 sm:$0x3]  ;;  %s1392_s30 = smov 94   ;;  %s1393_s5 = smov 98  }
  0x73   : > { %340 = vrot.lane.b32.xlu1 %v335_v6, %s1385_s18  ;;  %257 = vrot.lane.b32.xlu0 %v252_v7, %s1386_s20  ;;  %v630_v17 = vrot.slane %v621_v16, %v1604_v3  ;;  %v626_v18 = vrot.slane %v621_v16, %v1602_v2  ;;  %v708_v21 = vrot.slane %v703_v19, %v1602_v2  ;;  %v390_v33 = vld [vmem:[#allocation9 + $0x4] ss:$8 sm:$0x3]  ;;  %v473_v36 = vld [vmem:[#allocation9 + $0x6] ss:$8 sm:$0x3] }
  0x74   : > { %v712_v22 = vrot.slane %v703_v19, %v1604_v3  ;;  %v607_v23 = vrot.slane %v1618_v20, %v1604_v3  ;;  %v794_v25 = vrot.slane %v785_v24, %v1604_v3  ;;  %v790_v26 = vrot.slane %v785_v24, %v1602_v2  ;;  %s1394_s6 = smov 112   ;;  %v555_v39 = vld [vmem:[#allocation9 + $0x11] ss:$8 sm:$0x3]  ;;  %s1395_s25 = smov 126  }
  0x75   : > { %v233_v28 = vrot.slane %v224_v27, %v1604_v3  ;;  %v229_v29 = vrot.slane %v224_v27, %v1602_v2  ;;  %v316_v31 = vrot.slane %v307_v30, %v1604_v3  ;;  %v312_v32 = vrot.slane %v307_v30, %v1602_v2  ;;  %s1396_s9 = smov 1   ;;  %s1397_s24 = smov 2   ;;  %v1652_v51 = vld [vmem:[%s1592_s28 + $0x8] sm:$0xff] }
  0x76   : > { %v399_v34 = vrot.slane %v390_v33, %v1604_v3  ;;  %v395_v35 = vrot.slane %v390_v33, %v1602_v2  ;;  %v482_v37 = vrot.slane %v473_v36, %v1604_v3  ;;  %v478_v38 = vrot.slane %v473_v36, %v1602_v2  ;;  %s1398_s10 = smov 115   ;;  %s1399_s27 = smov 16  }
  0x77   : > { %342 = vrot.lane.b32.xlu1 %v339_v8, %s1385_s18  ;;  %259 = vrot.lane.b32.xlu0 %v256_v9, %s1386_s20  ;;  %v560_v40 = vrot.slane %v555_v39, %v1602_v2  ;;  %v564_v41 = vrot.slane %v555_v39, %v1604_v3  ;;  %v603_v42 = vrot.slane %v1618_v20, %v1602_v2  ;;  %vm344_vm1 = vcmask 908288   ;;  %s1400_s28 = smov 30   ;;  %s1401_s18 = smov 34  }
  0x78   : > { %vm444_vm2 = vcmask 1039360   ;;  %vm635_vm3 = vcmask 121856   ;;  %vm427_vm4 = vcmask 924672   ;;  %vm238_vm5 = vcmask 769024   ;;  %s213_s20 = scalar_lea.vmem [#allocation10], %s1069_s21 }
  0x79   : > { %vm321_vm6 = vcmask 801792   ;;  %vm717_vm7 = vcmask 138240   ;;  %vm404_vm8 = vcmask 916480   ;;  %vm799_vm9 = vcmask 261120  }
  0x7a   : > { %vm278_vm10 = vcmask 1031168   ;;  %vm569_vm11 = vcmask 7168   ;;  %vm361_vm12 = vcmask 941056   ;;  %vm542_vm13 = vcmask 15360  }
  0x7b   : > { %425 = vrot.lane.b32.xlu1 %v422_v11, %s1387_s17  ;;  %423 = vrot.lane.b32.xlu0 %v418_v12, %s1387_s17  ;;  %vm462_vm14 = vcmask 130048   ;;  %vm379_vm15 = vcmask 244736   ;;  %s971_s17 = sshll.u32 %s213_s20, 4  ;;  %s1853_s17 = int_to_ptr.vmem [resolvable:$true] %s971_s17 }
  0x7c   : > { %s1308_s21 = scalar_lea.vmem %s1853_s17, 256 }
  0x7d   : > { %p1309_p2 = scmp.ne.s32.totalorder %s1853_s17, %s1308_s21 }
  0x7f   : > { %507 = vrot.lane.b32.xlu1 %v504_v14, %s1388_s23  ;;  %505 = vrot.lane.b32.xlu0 %v500_v15, %s1388_s23  ;;  %p1310_p1 = pnand %p1309_p2, %p1537_p4 }
  0x81   : > { %p1311_p6 = pneg %p1310_p1 }
  0x83   : > { %633 = vrot.lane.b32.xlu1 %v630_v17, %s1389_s26  ;;  %631 = vrot.lane.b32.xlu0 %v626_v18, %s1389_s26 }
  0x87   : > { %713 = vrot.lane.b32.xlu0 %v708_v21, %s1390_s22  ;;  %715 = vrot.lane.b32.xlu1 %v712_v22, %s1390_s22 }
  0x8b   : > { %797 = vrot.lane.b32.xlu1 %v794_v25, %s1391_s29  ;;  %795 = vrot.lane.b32.xlu0 %v790_v26, %s1391_s29  ;;  %v680_v25 = vld [vmem:[#allocation9 + $0x14] ss:$8 sm:$0x3] }
  0x8c   : > { %v689_v30 = vrot.slane %v680_v25, %v1604_v3  ;;  %v685_v33 = vrot.slane %v680_v25, %v1602_v2 }
  0x8f   : > { %236 = vrot.lane.b32.xlu1 %v233_v28, %s1392_s30  ;;  %234 = vrot.lane.b32.xlu0 %v229_v29, %s1392_s30 }
  0x93   : > { %319 = vrot.lane.b32.xlu1 %v316_v31, %s1393_s5  ;;  %317 = vrot.lane.b32.xlu0 %v312_v32, %s1393_s5 }
  0x97   : > { %402 = vrot.lane.b32.xlu1 %v399_v34, %s1394_s6  ;;  %400 = vrot.lane.b32.xlu0 %v395_v35, %s1394_s6 }
  0x9b   : > { %485 = vrot.lane.b32.xlu1 %v482_v37, %s1395_s25  ;;  %483 = vrot.lane.b32.xlu0 %v478_v38, %s1395_s25  ;;  %v762_v37 = vld [vmem:[#allocation9 + $0x16] ss:$8 sm:$0x3] }
  0x9f   : > { %565 = vrot.lane.b32.xlu1 %v560_v40, %s1396_s9  ;;  %567 = vrot.lane.b32.xlu0 %v564_v41, %s1396_s9  ;;  %v767_v40 = vrot.slane %v762_v37, %v1602_v2 }
  0xa3   : > { %608 = vrot.lane.b32.xlu1 %v603_v42, %s1397_s24 }
  0xe5   : > { %v341_v43 = vpop.permute.xlu1 %340  ;;  %v258_v44 = vpop.permute.xlu0 %257 }
  0xe6   : > { %v266_v45 = vmul.f32 0.0, %v258_v44  ;;  %v349_v1 = vmul.f32 0.0, %v341_v43 }
  0xe8   : > { %272 = vrot.lane.b32.xlu1 %v266_v45, %s1395_s25 }
  0xe9   : > { %v343_v46 = vpop.permute.xlu1 %342  ;;  %v260_v47 = vpop.permute.xlu0 %259 }
  0xea   : > { %v262_v52 = vsel %vm261_vm0, %v258_v44, %v260_v47  ;;  %v268_v58 = vmul.f32 %v260_v47, %v1652_v51  ;;  %v345_v60 = vsel %vm344_vm1, %v341_v43, %v343_v46  ;;  %v351_v6 = vmul.f32 %v343_v46, %v1652_v51 }
  0xeb   : > { %v267_v57 = vmul.f32 %v262_v52, %v1649_v50  ;;  %v350_v5 = vmul.f32 %v345_v60, %v1649_v50  ;;  %v771_v43 = vrot.slane %v762_v37, %v1604_v3  ;;  %vm296_vm0 = vcmask 277504  }
  0xed   : > { %v426_v48 = vpop.permute.xlu1 %425  ;;  %v424_v49 = vpop.permute.xlu0 %423  ;;  %v1175_v7 = vpack.i.bf16 %v268_v58, %v267_v57  ;;  %v1180_v14 = vpack.i.bf16 %v351_v6, %v350_v5 }
  0xee   : > { %v428_v8 = vsel %vm427_vm4, %v424_v49, %v426_v48  ;;  %v432_v13 = vmul.f32 0.0, %v424_v49  ;;  %v434_v15 = vmul.f32 %v426_v48, %v1652_v51 }
  0xef   : > { %v433_v16 = vmul.f32 %v428_v8, %v1649_v50 }
  0xf1   : > { %v508_v53 = vpop.permute.xlu1 %507  ;;  %v506_v54 = vpop.permute.xlu0 %505  ;;  %v1190_v24 = vpack.i.bf16 %v434_v15, %v433_v16 }
  0xf2   : > { %v515_v55 = vmul.f32 %v508_v53, %v1652_v51  ;;  %v513_v56 = vmul.f32 0.0, %v506_v54  ;;  %v509_v63 = vsel %vm444_vm2, %v506_v54, %v508_v53  ;;  %v844_v53 = vld [vmem:[#allocation9 + $0x20] ss:$8 sm:$0x3] }
  0xf3   : > { %v514_v9 = vmul.f32 %v509_v63, %v1649_v50  ;;  %v853_v57 = vrot.slane %v844_v53, %v1604_v3 }
  0xf4   : > { %v1170_v59 = vpack.i.bf16 %v513_v56, %v515_v55 }
  0xf5   : > { %v634_v61 = vpop.permute.xlu1 %633  ;;  %v632_v62 = vpop.permute.xlu0 %631  ;;  %v1195_v19 = vpack.i.bf16 %v514_v9, %v432_v13 }
  0xf6   : > { %v636_v0 = vsel %vm635_vm3, %v632_v62, %v634_v61  ;;  %1171 = vrot.lane.b32.xlu0 %v1170_v59, %s1388_s23  ;;  %v642_v17 = vmul.f32 0.0, %v634_v61  ;;  %v640_v18 = vmul.f32 %v632_v62, %v1649_v50  ;;  %v849_v59 = vrot.slane %v844_v53, %v1602_v2 }
  0xf7   : > { %v641_v4 = vmul.f32 %v636_v0, %v1652_v51 }
  0xf8   : > { %v1200_v26 = vpack.i.bf16 %v640_v18, %v642_v17 }
  0xf9   : > { %v1185_v10 = vpack.i.bf16 %v641_v4, %v349_v1  ;;  %v714_v11 = vpop.permute.xlu0 %713  ;;  %v716_v12 = vpop.permute.xlu1 %715 }
  0xfa   : > { %1176 = vrot.lane.b32.xlu0 %v1175_v7, %s1395_s25  ;;  %v722_v35 = vmul.f32 %v714_v11, %v1649_v50  ;;  %v718_v36 = vsel %vm717_vm7, %v714_v11, %v716_v12 }
  0xfb   : > { %1186 = vrot.lane.b32.xlu1 %v1185_v10, %s1398_s10  ;;  %v723_v20 = vmul.f32 %v718_v36, %v1652_v51 }
  0xfd   : > { %v798_v21 = vpop.permute.xlu1 %797  ;;  %v796_v22 = vpop.permute.xlu0 %795 }
  0xfe   : > { %1181 = vrot.lane.b32.xlu0 %v1180_v14, %s1398_s10  ;;  %v800_v42 = vsel %vm799_vm9, %v796_v22, %v798_v21  ;;  %v806_v47 = vmul.f32 0.0, %v798_v21  ;;  %v804_v52 = vmul.f32 %v796_v22, %v1649_v50 }
  0xff   : > { %1196 = vrot.lane.b32.xlu1 %v1195_v19, %s1388_s23  ;;  %v805_v48 = vmul.f32 %v800_v42, %v1652_v51 }
 0x101   : > { %v1668_v27 = vpop.permute.xlu1 %236  ;;  %v1670_v28 = vpop.permute.xlu0 %234  ;;  %v1210_v55 = vpack.i.bf16 %v806_v47, %v805_v48 }
 0x102   : > { %1191 = vrot.lane.b32.xlu0 %v1190_v24, %s1388_s23  ;;  %v1676_v29 = vsel %vm238_vm5, %v1670_v28, %v1668_v27  ;;  %v245_v4 = vmul.f32 %v1668_v27, %v1652_v51 }
 0x103   : > { %1201 = vrot.lane.b32.xlu1 %v1200_v26, %s1398_s10  ;;  %v244_v27 = vmul.f32 %v1676_v29, %v1649_v50 }
 0x105   : > { %v320_v31 = vpop.permute.xlu1 %319  ;;  %v1679_v32 = vpop.permute.xlu0 %317 }
 0x106   : > { %610 = vrot.lane.b32.xlu0 %v607_v23, %s1397_s24  ;;  %v1688_v34 = vsel %vm321_vm6, %v1679_v32, %v320_v31  ;;  %v724_v23 = vmul.f32 0.0, %v716_v12  ;;  %v328_v9 = vmul.f32 %v320_v31, %v1652_v51 }
 0x107   : > { %692 = vrot.lane.b32.xlu1 %v689_v30, %s1399_s27 }
 0x108   : > { %v1205_v46 = vpack.i.bf16 %v724_v23, %v723_v20  ;;  %v243_v23 = vmul.f32 0.0, %v1670_v28  ;;  %v326_v28 = vmul.f32 0.0, %v1679_v32 }
 0x109   : > { %v403_v38 = vpop.permute.xlu1 %402  ;;  %v1692_v39 = vpop.permute.xlu0 %400 }
 0x10a   : > { %690 = vrot.lane.b32.xlu0 %v685_v33, %s1399_s27  ;;  %v1699_v41 = vsel %vm404_vm8, %v1692_v39, %v403_v38  ;;  %v411_v16 = vmul.f32 %v403_v38, %v1652_v51 }
 0x10b   : > { %728 = vrot.lane.b32.xlu1 %v722_v35, %s1388_s23 }
 0x10d   : > { %v486_v44 = vpop.permute.xlu1 %485  ;;  %v1703_v45 = vpop.permute.xlu0 %483 }
 0x10e   : > { %772 = vrot.lane.b32.xlu0 %v767_v40, %s1400_s28  ;;  %v1709_v49 = vsel %vm278_vm10, %v1703_v45, %v486_v44  ;;  %v493_v17 = vmul.f32 %v486_v44, %v1652_v51  ;;  %v327_v40 = vmul.f32 %v1688_v34, %v1649_v50  ;;  %v410_v34 = vmul.f32 %v1699_v41, %v1649_v50 }
 0x10f   : > { %774 = vrot.lane.b32.xlu1 %v771_v43, %s1400_s28  ;;  %v492_v32 = vmul.f32 %v1709_v49, %v1649_v50  ;;  %v491_v49 = vmul.f32 0.0, %v1703_v45 }
 0x111   : > { %v568_v54 = vpop.permute.xlu0 %567  ;;  %v566_v56 = vpop.permute.xlu1 %565 }
 0x112   : > { %1206 = vrot.lane.b32.xlu0 %v1205_v46, %s1388_s23  ;;  %v570_v58 = vsel %vm569_vm11, %v566_v56, %v568_v54  ;;  %v576_v61 = vmul.f32 0.0, %v568_v54  ;;  %v574_v62 = vmul.f32 %v566_v56, %v1649_v50 }
 0x113   : > { %810 = vrot.lane.b32.xlu1 %v804_v52, %s1395_s25  ;;  %v575_v60 = vmul.f32 %v570_v58, %v1652_v51 }
 0x115   : > { %v1215_v63 = vpack.i.bf16 %v576_v61, %v575_v60  ;;  %v1724_v3 = vpop.permute.xlu1 %608  ;;  %v409_v60 = vmul.f32 0.0, %v1692_v39 }
 0x116   : > { %1211 = vrot.lane.b32.xlu0 %v1210_v55, %s1395_s25 }
 0x117   : > { %856 = vrot.lane.b32.xlu1 %v853_v57, %s1401_s18 }
 0x11a   : > { %854 = vrot.lane.b32.xlu0 %v849_v59, %s1401_s18 }
 0x11b   : > { %580 = vrot.lane.b32.xlu1 %v574_v62, %s1388_s23 }
 0x11e   : > { %1216 = vrot.lane.b32.xlu0 %v1215_v63, %s1388_s23  ;;  %s1082_s23 = sshll.u32 %s1445_s16, 8  ;;  %s1403_s16 = smov [#allocation10]  }
 0x11f   : > { %s1858_s29 = scalar_lea.hbm %s1903_s3, %s1082_s23 }
 0x15a   : > { %v273_v2 = vpop.permute.xlu1 %272 }
 0x168   : > { %v1726_v0 = vpop.permute.xlu0 %1171 }
 0x169   : > { %v1173_v12 = vunpack.i.l.bf16 %v1726_v0  ;;  %v1174_v41 = vunpack.i.h.bf16 %v1726_v0 }
 0x16b   : > { %v532_v21 = vpack.c.bf16 %v1173_v12, %v493_v17 }
 0x16c   : > { %v1177_v1 = vpop.permute.xlu0 %1176 }
 0x16d   : > { %v1179_v5 = vunpack.i.h.bf16 %v1177_v1  ;;  %v1730_v6 = vpop.permute.xlu1 %1186  ;;  %v1178_v14 = vunpack.i.l.bf16 %v1177_v1 }
 0x16e   : > { %v1188_v42 = vunpack.i.l.bf16 %v1730_v6 }
 0x16f   : > { %v286_v7 = vpack.c.bf16 %v1179_v5, %v245_v4  ;;  %v280_v26 = vsel %vm278_vm10, %v1178_v14, %v1179_v5  ;;  %v279_v29 = vsel %vm278_vm10, %v273_v2, %v1178_v14 }
 0x170   : > { %v1182_v8 = vpop.permute.xlu0 %1181  ;;  %v285_v36 = vpack.c.bf16 %v280_v26, %v244_v27  ;;  %v284_v44 = vpack.c.bf16 %v279_v29, %v243_v23 }
 0x171   : > { %v1184_v10 = vunpack.i.h.bf16 %v1182_v8  ;;  %v1733_v11 = vpop.permute.xlu1 %1196  ;;  %294 = vrot.lane.b32.xlu1 %v286_v7, %s1401_s18  ;;  %v1183_v24 = vunpack.i.l.bf16 %v1182_v8 }
 0x172   : > { %v1199_v46 = vunpack.i.h.bf16 %v1733_v11  ;;  %v1198_v54 = vunpack.i.l.bf16 %v1733_v11 }
 0x173   : > { %v369_v13 = vpack.c.bf16 %v1184_v10, %v328_v9  ;;  %v363_v20 = vsel %vm361_vm12, %v1183_v24, %v1184_v10  ;;  %v362_v48 = vsel %vm361_vm12, %v1188_v42, %v1183_v24 }
 0x174   : > { %v1192_v15 = vpop.permute.xlu0 %1191  ;;  %v368_v43 = vpack.c.bf16 %v363_v20, %v327_v40  ;;  %v367_v55 = vpack.c.bf16 %v362_v48, %v326_v28  ;;  %v526_v58 = vsel %vm444_vm2, %v1199_v46, %v1173_v12  ;;  %v525_v39 = vsel %vm444_vm2, %v1174_v41, %v1199_v46  ;;  %v1813_v20 = vld [vmem:[#allocation7] sm:$0xff] }
 0x175   : > { %v1194_v18 = vunpack.i.h.bf16 %v1192_v15  ;;  %377 = vrot.lane.b32.xlu0 %v369_v13, %s1400_s28  ;;  %v1740_v19 = vpop.permute.xlu1 %1201  ;;  %v1193_v37 = vunpack.i.l.bf16 %v1192_v15  ;;  %v531_v2 = vpack.c.bf16 %v526_v58, %v492_v32  ;;  %v530_v11 = vpack.c.bf16 %v525_v39, %v491_v49 }
 0x176   : > { %v1203_v30 = vunpack.i.l.bf16 %v1740_v19  ;;  %v1189_v12 = vunpack.i.h.bf16 %v1730_v6  ;;  %v1204_v13 = vunpack.i.h.bf16 %v1740_v19  ;;  %v1074_v29 = vcombine.high %v1813_v20, %v1813_v20 }
 0x177   : > { %v452_v22 = vpack.c.bf16 %v1194_v18, %v411_v16  ;;  %v446_v52 = vsel %vm444_vm2, %v1193_v37, %v1194_v18  ;;  %v445_v59 = vsel %vm444_vm2, %v1198_v54, %v1193_v37 }
 0x178   : > { %v611_v25 = vpop.permute.xlu0 %610  ;;  %v451_v56 = vpack.c.bf16 %v446_v52, %v410_v34  ;;  %v450_v1 = vpack.c.bf16 %v445_v59, %v409_v60  ;;  %v653_v16 = vsel %vm361_vm12, %v1189_v12, %v1203_v30  ;;  %v652_v24 = vsel %vm361_vm12, %v1204_v13, %v1189_v12  ;;  %1075 = vmatprep.mubr.msk.bf16.mxu0 %vm462_vm14, %v1074_v29 }
 0x179   : > { %v619_v31 = vmul.f32 0.0, %v611_v25  ;;  %540 = vrot.lane.b32.xlu0 %v532_v21, %s1397_s24  ;;  %460 = vrot.lane.b32.xlu1 %v452_v22, %s1399_s27  ;;  %v693_v35 = vpop.permute.xlu1 %692  ;;  %v613_v4 = vsel %vm542_vm13, %v1724_v3, %v611_v25  ;;  %v617_v25 = vmul.f32 %v1724_v3, %v1649_v50 }
 0x17a   : > { %v701_v61 = vmul.f32 0.0, %v693_v35  ;;  %v618_v0 = vmul.f32 %v613_v4, %v1652_v51 }
 0x17b   : > { %v659_v33 = vpack.c.bf16 %v1203_v30, %v619_v31  ;;  %v657_v31 = vpack.c.bf16 %v652_v24, %v617_v25 }
 0x17c   : > { %v1750_v38 = vpop.permute.xlu0 %690  ;;  %v658_v17 = vpack.c.bf16 %v653_v16, %v618_v0 }
 0x17d   : > { %667 = vrot.lane.b32.xlu1 %v659_v33, %s1395_s25  ;;  %292 = vrot.lane.b32.xlu0 %v285_v36, %s1401_s18  ;;  %v729_v53 = vpop.permute.xlu1 %728  ;;  %v695_v45 = vsel %vm462_vm14, %v1750_v38, %v693_v35  ;;  %v699_v3 = vmul.f32 %v1750_v38, %v1649_v50 }
 0x17e   : > { %v700_v26 = vmul.f32 %v695_v45, %v1652_v51 }
 0x180   : > { %v1761_v47 = vpop.permute.xlu0 %772 }
 0x181   : > { %375 = vrot.lane.b32.xlu1 %v368_v43, %s1400_s28  ;;  %290 = vrot.lane.b32.xlu0 %v284_v44, %s1401_s18  ;;  %v775_v62 = vpop.permute.xlu1 %774  ;;  %v781_v38 = vmul.f32 %v1761_v47, %v1649_v50  ;;  %v1402_v43 = vmov 1.0  }
 0x182   : > { %v783_v7 = vmul.f32 0.0, %v775_v62  ;;  %v777_v19 = vsel %vm379_vm15, %v1761_v47, %v775_v62 }
 0x183   : > { %v782_v36 = vmul.f32 %v777_v19, %v1652_v51 }
 0x184   : > { %v1207_v57 = vpop.permute.xlu0 %1206 }
 0x185   : > { %373 = vrot.lane.b32.xlu1 %v367_v55, %s1400_s28  ;;  %458 = vrot.lane.b32.xlu0 %v451_v56, %s1399_s27  ;;  %v1209_v63 = vunpack.i.h.bf16 %v1207_v57  ;;  %v811_v10 = vpop.permute.xlu1 %810  ;;  %v1208_v14 = vunpack.i.l.bf16 %v1207_v57 }
 0x187   : > { %v741_v8 = vpack.c.bf16 %v1209_v63, %v701_v61  ;;  %v735_v22 = vsel %vm444_vm2, %v1208_v14, %v1209_v63  ;;  %v734_v33 = vsel %vm444_vm2, %v729_v53, %v1208_v14 }
 0x188   : > { %v1212_v5 = vpop.permute.xlu0 %1211  ;;  %v740_v30 = vpack.c.bf16 %v735_v22, %v700_v26  ;;  %v739_v23 = vpack.c.bf16 %v734_v33, %v699_v3  ;;  %v1073_v3 = vcombine.low %v1813_v20, %v1813_v20 }
 0x189   : > { %538 = vrot.lane.b32.xlu1 %v531_v2, %s1397_s24  ;;  %456 = vrot.lane.b32.xlu0 %v450_v1, %s1399_s27  ;;  %v1214_v9 = vunpack.i.h.bf16 %v1212_v5  ;;  %v857_v18 = vpop.permute.xlu1 %856  ;;  %v1213_v21 = vunpack.i.l.bf16 %v1212_v5 }
 0x18a   : > { %v865_v48 = vmul.f32 0.0, %v857_v18 }
 0x18b   : > { %v823_v15 = vpack.c.bf16 %v1214_v9, %v783_v7  ;;  %v817_v35 = vsel %vm278_vm10, %v1213_v21, %v1214_v9  ;;  %v816_v42 = vsel %vm278_vm10, %v811_v10, %v1213_v21 }
 0x18c   : > { %v855_v6 = vpop.permute.xlu0 %854  ;;  %v822_v40 = vpack.c.bf16 %v817_v35, %v782_v36  ;;  %v821_v46 = vpack.c.bf16 %v816_v42, %v781_v38  ;;  %v868_v28 = vpack.c.bf16 %v1402_v43, %v865_v48 }
 0x18d   : > { %536 = vrot.lane.b32.xlu1 %v530_v11, %s1397_s24  ;;  %749 = vrot.lane.b32.xlu0 %v741_v8, %s1394_s6  ;;  %v859_v27 = vsel %vm296_vm0, %v855_v6, %v857_v18  ;;  %v863_v52 = vmul.f32 %v855_v6, %v1649_v50  ;;  %v581_v53 = vpop.permute.xlu1 %580 }
 0x18e   : > { %v864_v37 = vmul.f32 %v859_v27, %v1652_v51 }
 0x18f   : > { %v866_v34 = vpack.c.bf16 %v1402_v43, %v863_v52 }
 0x190   : > { %v867_v44 = vpack.c.bf16 %v1402_v43, %v864_v37  ;;  %v1217_v47 = vpop.permute.xlu0 %1216 }
 0x191   : > { %831 = vrot.lane.b32.xlu1 %v823_v15, %s1393_s5  ;;  %665 = vrot.lane.b32.xlu0 %v658_v17, %s1395_s25  ;;  %v1219_v5 = vunpack.i.h.bf16 %v1217_v47  ;;  %v1218_v39 = vunpack.i.l.bf16 %v1217_v47 }
 0x193   : > { %v587_v9 = vsel %vm444_vm2, %v1218_v39, %v1219_v5  ;;  %v586_v12 = vsel %vm444_vm2, %v581_v53, %v1218_v39 }
 0x194   : > { %v591_v14 = vpack.c.bf16 %v587_v9, %v1652_v51  ;;  %v590_v15 = vpack.c.bf16 %v586_v12, %v1649_v50 }
 0x195   : > { %747 = vrot.lane.b32.xlu1 %v740_v30, %s1394_s6  ;;  %663 = vrot.lane.b32.xlu0 %v657_v31, %s1395_s25 }
 0x199   : > { %745 = vrot.lane.b32.xlu1 %v739_v23, %s1394_s6  ;;  %829 = vrot.lane.b32.xlu0 %v822_v40, %s1393_s5 }
 0x19d   : > { %874 = vrot.lane.b32.xlu1 %v867_v44, %s1392_s30  ;;  %827 = vrot.lane.b32.xlu0 %v821_v46, %s1393_s5  ;;  %s1312_s5 = sshll.u32 %s1403_s16, 4  ;;  %s1313_s5 = int_to_ptr.vmem [resolvable:$false] %s1312_s5 }
 0x19e   : > { %s1314_s6 = scalar_lea.vmem %s1313_s5, 512  ;;  %p1315_p8 = scmp.lt.s32.totalorder %s1853_s17, %s1313_s5 }
 0x19f   : > { %p1316_p12 = scmp.lt.s32.totalorder %s1314_s6, %s1308_s21 }
 0x1a1   : > { %872 = vrot.lane.b32.xlu1 %v866_v34, %s1392_s30  ;;  %876 = vrot.lane.b32.xlu0 %v868_v28, %s1392_s30  ;;  %s957_s30 = scalar_lea.sflag [#allocation6], %s1586_s11  ;;  %p1317_p3 = por %p1316_p12, %p1315_p8 }
 0x1a3   : > { %p1318_p7 = pnand %p1317_p3, %p1311_p6 }
 0x1e3   : > { %v295_v54 = vpop.permute.xlu1 %294 }
 0x1e7   : > { %v378_v55 = vpop.permute.xlu0 %377 }
 0x1eb   : > { %v541_v56 = vpop.permute.xlu0 %540  ;;  %v461_v57 = vpop.permute.xlu1 %460 }
 0x1ef   : > { %v668_v58 = vpop.permute.xlu1 %667  ;;  %v293_v59 = vpop.permute.xlu0 %292 }
 0x1f0   : > { %v298_v60 = vsel %vm296_vm0, %v293_v59, %v295_v54 }
 0x1f1   : > { %913 = vmatprep.subr.bf16.mxu0 %v298_v60 }
 0x1f3   : > { %v376_v32 = vpop.permute.xlu1 %375  ;;  %v291_v41 = vpop.permute.xlu0 %290 }
 0x1f4   : > { %v297_v61 = vsel %vm296_vm0, %v291_v41, %v293_v59  ;;  %v381_v62 = vsel %vm379_vm15, %v376_v32, %v378_v55 }
 0x1f5   : > { %914 = vmatpush1.bf16.msra.mxu0 %v297_v61 }
 0x1f6   : > { %915 = vmatprep.subr.bf16.mxu0 %v381_v62 }
 0x1f7   : > { %v374_v63 = vpop.permute.xlu1 %373  ;;  %v459_v2 = vpop.permute.xlu0 %458 }
 0x1f8   : > { %v380_v1 = vsel %vm379_vm15, %v374_v63, %v376_v32  ;;  %v464_v4 = vsel %vm462_vm14, %v459_v2, %v461_v57 }
 0x1f9   : > { %916 = vmatpush1.bf16.msra.mxu0 %v380_v1 }
 0x1fa   : > { %917 = vmatprep.subr.bf16.mxu0 %v464_v4 }
 0x1fb   : > { %v539_v49 = vpop.permute.xlu1 %538  ;;  %v457_v7 = vpop.permute.xlu0 %456 }
 0x1fc   : > { %v463_v0 = vsel %vm462_vm14, %v457_v7, %v459_v2  ;;  %v544_v8 = vsel %vm542_vm13, %v539_v49, %v541_v56 }
 0x1fd   : > { %918 = vmatpush1.bf16.msra.mxu0 %v463_v0 }
 0x1fe   : > { %919 = vmatprep.subr.bf16.mxu0 %v544_v8 }
 0x1ff   : > { %v537_v10 = vpop.permute.xlu1 %536  ;;  %v750_v11 = vpop.permute.xlu0 %749 }
 0x200   : > { %v543_v13 = vsel %vm542_vm13, %v537_v10, %v539_v49 }
 0x201   : > { %920 = vmatpush1.bf16.msra.mxu0 %v543_v13 }
 0x202   : > { %921 = vmatprep.subr.bf16.mxu0 %v591_v14 }
 0x203   : > { %v832_v45 = vpop.permute.xlu1 %831  ;;  %v666_v16 = vpop.permute.xlu0 %665 }
 0x204   : > { %v671_v17 = vsel %vm278_vm10, %v666_v16, %v668_v58 }
 0x205   : > { %922 = vmatpush1.bf16.msra.mxu0 %v590_v15 }
 0x206   : > { %923 = vmatprep.subr.bf16.mxu0 %v671_v17 }
 0x207   : > { %v748_v18 = vpop.permute.xlu1 %747  ;;  %v664_v6 = vpop.permute.xlu0 %663 }
 0x208   : > { %v670_v21 = vsel %vm278_vm10, %v664_v6, %v666_v16  ;;  %v753_v22 = vsel %vm404_vm8, %v748_v18, %v750_v11 }
 0x209   : > { %924 = vmatpush1.bf16.msra.mxu0 %v670_v21 }
 0x20a   : > { %925 = vmatprep.subr.bf16.mxu0 %v753_v22 }
 0x20b   : > { %v746_v24 = vpop.permute.xlu1 %745  ;;  %v830_v51 = vpop.permute.xlu0 %829 }
 0x20c   : > { %v752_v25 = vsel %vm404_vm8, %v746_v24, %v748_v18  ;;  %v835_v50 = vsel %vm321_vm6, %v830_v51, %v832_v45 }
 0x20d   : > { %926 = vmatpush1.bf16.msra.mxu0 %v752_v25 }
 0x20e   : > { %927 = vmatprep.subr.bf16.mxu0 %v835_v50 }
 0x20f   : > { %v875_v26 = vpop.permute.xlu1 %874  ;;  %v828_v19 = vpop.permute.xlu0 %827 }
 0x210   : > { %v834_v27 = vsel %vm321_vm6, %v828_v19, %v830_v51 }
 0x211   : > { %928 = vmatpush1.bf16.msra.mxu0 %v834_v27 }
 0x213   : > { %v873_v30 = vpop.permute.xlu1 %872  ;;  %v877_v31 = vpop.permute.xlu0 %876 }
 0x214   : > { %v880_v33 = vsel %vm238_vm5, %v875_v26, %v877_v31  ;;  %v879_v35 = vsel %vm238_vm5, %v873_v30, %v875_v26 }
 0x215   : > { %929 = vmatprep.subr.bf16.mxu0 %v880_v33 }
 0x216   : > { %930 = vmatpush1.bf16.msra.mxu0 %v879_v35 }
 0x219   : > { %946 = vmatmul.mubr.bf16.vlgmr.msra.gmra.mrb[0].mxu0 %v1073_v3 }
 0x2ec   : > { %v947_v36 = vpop.f32.mrb[0].mxu0 }
 0x2ed   : > { %954 = vst [vmem:[%s213_s20] sm:$0xff] %v947_v36  ;;  %v949_v37 = vpop.f32.mrb[1].mxu0 }
 0x2ee   : > { %955 = vst [vmem:[%s213_s20 + $0x8] sm:$0xff] %v949_v37  ;;  %v951_v20 = vpop.f32.mrb[2].mxu0 }
 0x2ef   : > { %v952_v29 = vpop.f32.mrb[3].mxu0 }
 0x2f0   : > { %1321 = shalt.err (!%p1318_p7)
}
 0x2f1   : > { %s1322_s11 = scalar_lea.hbm %s1858_s29, 256  ;;  %s1326_s24 = scalar_lea.hbm %s1903_s3, 512 }
 0x2f2   : > { %p1323_p10 = scmp.ne.s32.totalorder %s1858_s29, %s1322_s11  ;;  %p1327_p0 = scmp.lt.u32.totalorder %s1858_s29, %s1903_s3 }
 0x2f3   : > { %p1328_p11 = scmp.lt.u32.totalorder %s1326_s24, %s1322_s11  ;;  %p1330_p2 = scmp.lt.u32.totalorder %s1322_s11, %s1858_s29 }
 0x2f4   : > { %p1324_p13 = pnand %p1323_p10, %p1537_p4 }
 0x2f5   : > { %p1329_p9 = por %p1328_p11, %p1327_p0 }
 0x2f6   : > { %p1325_p5 = pneg %p1324_p13 }
 0x2f7   : > { %p1331_p1 = por %p1330_p2, %p1329_p9 }
 0x2f9   : > { %p1332_p6 = pnand %p1331_p1, %p1325_p5 }
 0x2fb   : > { %1335 = shalt.err (!%p1332_p6)
}
 0x2fc   : > { %1093 = dma.vmem_to_hbm [thread:$0]  (%p1537_p4), %s1853_s17, 256, %s1858_s29, %s957_s30  }
 0x2fd PF: > { %s983_s28 = sand.u32 1, %s1366_s12   ;;  %p1918_p8 = scmp.ne.s32.totalorder %s1908_s19, 0 }
 0x2fe   : > { %p1919_p12 = scmp.ge.s32.totalorder %s1378_s15, 2  ;;  %s984_s18 = scalar_lea.sflag [#allocation6], %s983_s28 }
 0x300   : > { %p1107_p3 = pnand %p1919_p12, %p1918_p8 }
 0x302   : > { %1361 = dma.done.wait (!%p1107_p3), %s984_s18, 256  }
 0x303   : > { %1363 = vsyncadd (!%p1107_p3), %s984_s18, 4294967040  ;;  %p17_p7 = scmp.ge.s32.totalorder %s1527_s4, 4   ;;  %s1920_s12 = smov %s1370_s13 }
 0x304   : > { %s1921_s13 = smov %s1374_s14  ;;  %s1922_s14 = smov %s1543_s8 }
 0x305   : > { %s1923_s15 = smov %s1527_s4  ;;  %19 = sbr.rel (!%p17_p7) target bundleno = 6 (0x6), region = 100 }
 0x30c   :  { %989 = vsyncpa [#allocation5], 1 }
 0x30d   :  { %991 = vsyncpa [#allocation5 + $0x1], 1 }
 0x30e   :  { %992 = vsyncpa [#allocation8], 1 }
 0x30f   :  { %993 = vsyncpa [#allocation6], 1 }
 0x310   :  { %995 = vsyncpa [#allocation6 + $0x1], 1 }

</bundles_post_ra>
